<compile_context>
chip_gen: v7x
topology: tpu7x:2x2x1
jax: 0.10.0
libtpu: 0.0.40
codegen_flags: <defaults>
</compile_context>

<pallas_src>
import jax
import jax.numpy as jnp
from jax.experimental import pallas as pl
from jax.experimental.pallas import tpu as pltpu


def _round_up(x: int, m: int) -> int:
    return ((x + m - 1) // m) * m


def calibrated_matmul_kernel(temp_ref, x_ref, w_ref, b_ref, o_ref, acc_ref):
    # temp_ref: (1,)      f32 SMEM   calibration temperature (> 0)
    # x_ref:    (tm, tk)  bf16 VMEM  input tile
    # w_ref:    (tk, tn)  bf16 VMEM  weight tile
    # b_ref:    (1, tn)   f32 VMEM   bias tile
    # o_ref:    (tm, tn)  f32 VMEM   calibrated-logit tile
    # acc_ref:  (tm, tn)  f32 VMEM   accumulator (resident across the K axis)
    kk = pl.program_id(2)

    @pl.when(kk == 0)
    def _init():
        acc_ref[...] = jnp.zeros_like(acc_ref)

    acc_ref[...] += jnp.dot(
        x_ref[...], w_ref[...], preferred_element_type=jnp.float32
    )

    @pl.when(kk == pl.num_programs(2) - 1)
    def _finalize():
        inv_temp = 1.0 / temp_ref[0]          # scalar, done once per output tile
        o_ref[...] = ((acc_ref[...] + b_ref[...]) * inv_temp).astype(o_ref.dtype)


def calibrated_model(x_nchw, w, b, temp):
    """Pallas equivalent of CalibratedModel(model, temp)(x) with model = Linear."""
    n = x_nchw.shape[0]
    x_flat = x_nchw.reshape(n, -1)            # same order as torch .view(N, -1)
    f, k_out = w.shape
    assert x_flat.shape[1] == f
    assert temp > 0.0

    # ---- tile sizes (MXU / lane aligned, adapted to the problem size) -------
    tm = min(256, _round_up(n, 16))           # rows  (sublane granule, bf16-safe)
    tn = min(256, _round_up(k_out, 128))      # cols  (lane granule -> dense vst)
    tk = min(512, _round_up(f, 128))          # reduction panel

    n_pad = _round_up(n, tm)
    k_pad = _round_up(k_out, tn)
    f_pad = _round_up(f, tk)

    # ---- pad + cast (bf16 matmul inputs, f32 bias/temperature) --------------
    x_p = jnp.pad(x_flat.astype(jnp.float32),
                  ((0, n_pad - n), (0, f_pad - f))).astype(jnp.bfloat16)
    w_p = jnp.pad(w.astype(jnp.float32),
                  ((0, f_pad - f), (0, k_pad - k_out))).astype(jnp.bfloat16)
    b_p = jnp.pad(b.astype(jnp.float32).reshape(1, -1),
                  ((0, 0), (0, k_pad - k_out)))
    temp_arr = jnp.asarray([temp], dtype=jnp.float32)

    grid = (n_pad // tm, k_pad // tn, f_pad // tk)

    # ---- VMEM budget (double-buffered bf16 panels + f32 out + accumulator) --
    vmem_bytes = (
        2 * 2 * (tm * tk + tk * tn)   # bf16 x / w tiles, 2 buffers each
        + 2 * 4 * tm * tn             # f32 output tile, 2 buffers
        + 4 * tm * tn                 # f32 accumulator scratch
        + 2 * 4 * tn                  # f32 bias tile
    )
    vmem_limit = int(min(max(2 * vmem_bytes, 16 * 1024 * 1024), 48 * 1024 * 1024))

    cost = pl.CostEstimate(
        flops=2 * n_pad * f_pad * k_pad,
        transcendentals=0,
        bytes_accessed=(n_pad * f_pad * 2 + f_pad * k_pad * 2
                        + n_pad * k_pad * 4 + k_pad * 4),
    )

    out_padded = pl.pallas_call(
        calibrated_matmul_kernel,
        out_shape=jax.ShapeDtypeStruct((n_pad, k_pad), jnp.float32),
        grid_spec=pltpu.PrefetchScalarGridSpec(
            num_scalar_prefetch=0,
            grid=grid,
            in_specs=[
                pl.BlockSpec(memory_space=pltpu.MemorySpace.SMEM),       # temp
                pl.BlockSpec((tm, tk), lambda i, j, kk: (i, kk)),        # x tile
                pl.BlockSpec((tk, tn), lambda i, j, kk: (kk, j)),        # w tile
                pl.BlockSpec((1, tn), lambda i, j, kk: (0, j)),          # bias
            ],
            out_specs=pl.BlockSpec((tm, tn), lambda i, j, kk: (i, j)),
            scratch_shapes=[pltpu.VMEM((tm, tn), jnp.float32)],
        ),
        compiler_params=pltpu.CompilerParams(
            dimension_semantics=("parallel", "parallel", "arbitrary"),
            vmem_limit_bytes=vmem_limit,
        ),
        cost_estimate=cost,
    )(temp_arr, x_p, w_p, b_p)

    return out_padded[:n, :k_out]


if __name__ == "__main__":
    # Small shapes consistent with an NCHW image-classifier input.
    N, C, H, W = 2, 4, 16, 16
    F_DIM = C * H * W          # 1024 flattened features
    K = 10                     # number of classes
    TEMP = 1.5                 # calibration temperature (> 0)

    key = jax.random.PRNGKey(0)
    kx, kw, kb = jax.random.split(key, 3)

    x = jax.random.normal(kx, (N, C, H, W), dtype=jnp.float32)
    w = jax.random.normal(kw, (F_DIM, K), dtype=jnp.float32) * 0.02
    b = jax.random.normal(kb, (1, K), dtype=jnp.float32) * 0.1

    out = calibrated_model(x, w, b, TEMP)
    out = jax.block_until_ready(out)

    # Reference in plain JAX f32 (same semantics as model(x) / temp).
    ref = (x.reshape(N, -1) @ w + b) / TEMP
    assert out.shape == (N, K)
    # bf16 matmul inputs with f32 accumulation -> compare at bf16-level tolerance.
    assert jnp.allclose(out, ref, atol=5e-2, rtol=5e-2), float(
        jnp.max(jnp.abs(out - ref))
    )

    print("KERNEL_OK")
</pallas_src>

<mosaic_0001>
module attributes {stable_mosaic.version = 11 : i64} {
  func.func @calibrated_matmul_kernel(%arg0: i32, %arg1: i32, %arg2: i32, %arg3: memref<1xf32, #tpu.memory_space<smem>>, %arg4: memref<16x512xbf16, #tpu.memory_space<vmem>>, %arg5: memref<512x128xbf16, #tpu.memory_space<vmem>>, %arg6: memref<1x128xf32, #tpu.memory_space<vmem>>, %arg7: memref<16x128xf32, #tpu.memory_space<vmem>>, %arg8: memref<16x128xf32, #tpu.memory_space<vmem>>) attributes {dimension_semantics = [#tpu.dimension_semantics<parallel>, #tpu.dimension_semantics<parallel>, #tpu.dimension_semantics<arbitrary>], iteration_bounds = array<i64: 1, 1, 2>, scalar_prefetch = 0 : i64, scratch_operands = 1 : i64, tpu.core_type = #tpu.core_type<tc>, window_params = [{transform_indices = @transform_0, window_bounds = array<i64: 1>}, {transform_indices = @transform_1, window_bounds = array<i64: 16, 512>}, {transform_indices = @transform_2, window_bounds = array<i64: 512, 128>}, {transform_indices = @transform_3, window_bounds = array<i64: 1, 128>}, {transform_indices = @transform_4, window_bounds = array<i64: 16, 128>}]} {
    %c0_i32 = arith.constant 0 : i32
    %0 = arith.cmpi eq, %arg2, %c0_i32 : i32
    %1 = arith.extui %0 : i1 to i32
    %c0_i32_0 = arith.constant 0 : i32
    %2 = arith.cmpi ne, %1, %c0_i32_0 : i32
    scf.if %2 {
      %cst_9 = arith.constant 0.000000e+00 : f32
      %12 = vector.broadcast %cst_9 : f32 to vector<16x128xf32>
      %c0_10 = arith.constant 0 : index
      %c0_11 = arith.constant 0 : index
      %13 = vector.load %arg8[%c0_10, %c0_11] : memref<16x128xf32, #tpu.memory_space<vmem>>, vector<16x128xf32>
      tpu.vector_store %arg8[%c0_10, %c0_11], %12 {strides = array<i32>} : memref<16x128xf32, #tpu.memory_space<vmem>>, vector<16x128xf32>,
    } else {
    }
    %c0 = arith.constant 0 : index
    %c0_1 = arith.constant 0 : index
    %3 = vector.load %arg8[%c0, %c0_1] : memref<16x128xf32, #tpu.memory_space<vmem>>, vector<16x128xf32>
    %c0_2 = arith.constant 0 : index
    %c0_3 = arith.constant 0 : index
    %4 = vector.load %arg4[%c0_2, %c0_3] : memref<16x512xbf16, #tpu.memory_space<vmem>>, vector<16x512xbf16>
    %c0_4 = arith.constant 0 : index
    %c0_5 = arith.constant 0 : index
    %5 = vector.load %arg5[%c0_4, %c0_5] : memref<512x128xbf16, #tpu.memory_space<vmem>>, vector<512x128xbf16>
    %cst = arith.constant dense<0.000000e+00> : vector<16x128xf32>
    %6 = tpu.matmul %4, %5, %cst {dimension_numbers = #tpu.dot_dimension_numbers<[1], [0], [0], [1], [0, 0, 1, 1], [], []>} : vector<16x512xbf16>, vector<512x128xbf16>, vector<16x128xf32> -> vector<16x128xf32>
    %7 = arith.addf %3, %6 : vector<16x128xf32>
    %c0_6 = arith.constant 0 : index
    %c0_7 = arith.constant 0 : index
    %8 = vector.load %arg8[%c0_6, %c0_7] : memref<16x128xf32, #tpu.memory_space<vmem>>, vector<16x128xf32>
    tpu.vector_store %arg8[%c0_6, %c0_7], %7 {strides = array<i32>} : memref<16x128xf32, #tpu.memory_space<vmem>>, vector<16x128xf32>,
    %c1_i32 = arith.constant 1 : i32
    %9 = arith.cmpi eq, %arg2, %c1_i32 : i32
    %10 = arith.extui %9 : i1 to i32
    %c0_i32_8 = arith.constant 0 : i32
    %11 = arith.cmpi ne, %10, %c0_i32_8 : i32
    scf.if %11 {
      %c0_9 = arith.constant 0 : index
      %12 = memref.load %arg3[%c0_9] : memref<1xf32, #tpu.memory_space<smem>>
      %cst_10 = arith.constant 1.000000e+00 : f32
      %13 = arith.divf %cst_10, %12 : f32
      %c0_11 = arith.constant 0 : index
      %c0_12 = arith.constant 0 : index
      %14 = vector.load %arg8[%c0_11, %c0_12] : memref<16x128xf32, #tpu.memory_space<vmem>>, vector<16x128xf32>
      %c0_13 = arith.constant 0 : index
      %c0_14 = arith.constant 0 : index
      %15 = vector.load %arg6[%c0_13, %c0_14] : memref<1x128xf32, #tpu.memory_space<vmem>>, vector<1x128xf32>
      %16 = vector.broadcast %15 : vector<1x128xf32> to vector<16x128xf32>
      %17 = arith.addf %14, %16 : vector<16x128xf32>
      %18 = vector.broadcast %13 : f32 to vector<16x128xf32>
      %19 = arith.mulf %17, %18 : vector<16x128xf32>
      %c0_15 = arith.constant 0 : index
      %c0_16 = arith.constant 0 : index
      %20 = vector.load %arg7[%c0_15, %c0_16] : memref<16x128xf32, #tpu.memory_space<vmem>>, vector<16x128xf32>
      tpu.vector_store %arg7[%c0_15, %c0_16], %19 {strides = array<i32>} : memref<16x128xf32, #tpu.memory_space<vmem>>, vector<16x128xf32>,
    } else {
    }
    return
  }
  func.func @transform_0(%arg0: i32, %arg1: i32, %arg2: i32) -> i32 {
    %c0_i32 = arith.constant 0 : i32
    %c0_i32_0 = arith.constant 0 : i32
    return %c0_i32 : i32
  }
  func.func @transform_1(%arg0: i32, %arg1: i32, %arg2: i32) -> (i32, i32) {
    %c0_i32 = arith.constant 0 : i32
    return %arg0, %arg2 : i32, i32
  }
  func.func @transform_2(%arg0: i32, %arg1: i32, %arg2: i32) -> (i32, i32) {
    %c0_i32 = arith.constant 0 : i32
    return %arg2, %arg1 : i32, i32
  }
  func.func @transform_3(%arg0: i32, %arg1: i32, %arg2: i32) -> (i32, i32) {
    %c0_i32 = arith.constant 0 : i32
    %c0_i32_0 = arith.constant 0 : i32
    return %c0_i32, %arg1 : i32, i32
  }
  func.func @transform_4(%arg0: i32, %arg1: i32, %arg2: i32) -> (i32, i32) {
    %c0_i32 = arith.constant 0 : i32
    return %arg0, %arg1 : i32, i32
  }
}

</mosaic_0001>

<bundles_post_ra>
// kernel: tpu_custom_call.1
= control target key start
LH: loop header
LB: loop body
LE: loop exit
PB: predicated region body
PF: predicated region fallthrough
CT: control target
= control target key end

     0   :  { %s1463_s0 = inlined_call_operand.<no memory space> [shape: f32[1], index: 0, kind: input, shape index: {}]   ;;  %s1464_s1 = inlined_call_operand.hbm [shape: bf16[16,1024], index: 1, kind: input, shape index: {}]   ;;  %s1465_s2 = inlined_call_operand.hbm [shape: bf16[1024,128], index: 2, kind: input, shape index: {}]   ;;  %s1466_s3 = inlined_call_operand.vmem [shape: f32[1,128], index: 3, kind: input, shape index: {}]   ;;  %s1467_s4 = inlined_call_operand.hbm [shape: f32[16,128], index: 4, kind: output, shape index: {}]  }
   0x1   :  { %9 = sst [smem:[#allocation3]] %s1463_s0 }
   0x2   :  { %10 = vsyncpa [#allocation5], 0 }
   0x3   :  { %12 = vsyncpa [#allocation5 + $0x1], 0 }
   0x4   :  { %13 = vsyncpa [#allocation8], 0 }
   0x5   :  { %15 = vsyncpa [#allocation8 + $0x1], 0 }
   0x6   :  { %16 = vsyncpa [#allocation6], 0  ;;  %s1219_s17 = smov 0   ;;  %s1221_s18 = smov 0  }
   0x7   :  { %s1223_s19 = smov 0   ;;  %s1225_s20 = smov 0  }
   0x8   :  { %s1227_s21 = smov 0   ;;  %s1229_s22 = smov 0  }
   0x9 LB: > { %s815_s0 = sadd.s32 4294967295, %s1178_s22   ;;  %s34_s23 = sadd.s32 1, %s1174_s21  ;;  %s1178_s22 = sphi %s1229_s22, %s22_s22   ;;  %s1174_s21 = sphi %s1227_s21, %s1480_s21   ;;  %s1170_s20 = sphi %s1225_s20, %s1479_s20   ;;  %s1166_s19 = sphi %s1223_s19, %s1478_s19   ;;  %s1162_s18 = sphi %s1221_s18, %s1477_s18   ;;  %s1158_s17 = sphi %s1219_s17, %s1476_s17  }
   0xa   : > { %p35_p0 = scmp.ge.s32.totalorder %s34_s23, 2  ;;  %s71_s24 = sadd.s32 1, %s1166_s19 }
   0xb   : > { %p78_p1 = scmp.ne.s32.totalorder %s1166_s19, %s1162_s18  ;;  %p79_p2 = scmp.eq.s32.totalorder %s1178_s22, 0 }
   0xc   : > { %s1482_s23 = smov (%p35_p0, %s34_s23), 0  ;;  %p84_p4 = scmp.ne.s32.totalorder %s1162_s18, %s1158_s17 }
   0xd   : > { %p1255_p3 = por %p79_p2, %p78_p1  ;;  %s67_s26 = ssub.s32 %s1174_s21, %s1482_s23 }
   0xe   : > { %p85_p5 = scmp.eq.s32.totalorder %s815_s0, 0  ;;  %p69_p6 = scmp.eq.s32.totalorder %s67_s26, 0 }
   0xf   : > { %p934_p8 = scmp.lt.s32.totalorder %s1178_s22, 2  ;;  %s1273_s29 = sand.u32 1, %s1166_s19  }
  0x10   : > { %p1264_p7 = por %p85_p5, %p84_p4  ;;  %s871_s30 = sshll.u32 %s1174_s21, 8 }
  0x11   : > { %s1270_s28 = scalar_select %p69_p6, %s1166_s19, %s71_s24  }
  0x12   : > { %s1470_s27 = scalar_select %p1264_p7, 1, 0 }
  0x13   : > { %s819_s5 = sshll.u32 %s1273_s29, 5  ;;  %s1280_s8 = scalar_lea.hbm %s1464_s1, %s871_s30 }
  0x14   : > { %s203_s9 = scalar_lea.vmem [#allocation4], %s819_s5  ;;  %p1284_p9 = pnand %p934_p8, %p1255_p3 }
  0x15   : > { %s213_s10 = sshll.u32 %s203_s9, 4  ;;  %s200_s12 = scalar_lea.sflag [#allocation5], %s1273_s29  ;;  %s1288_s10 = int_to_ptr.vmem [resolvable:$true] %s213_s10 }
  0x16   : > { %s1034_s13 = scalar_lea.hbm %s1280_s8, 512  ;;  %p1036_p12 = pneg %p1284_p9 }
  0x17   : > { %p1035_p11 = scmp.ne.s32.totalorder %s1280_s8, %s1034_s13  ;;  %s1039_s16 = scalar_lea.hbm %s1464_s1, 1024 }
  0x18   : > { %p1040_p1 = scmp.lt.u32.totalorder %s1280_s8, %s1464_s1  ;;  %p1041_p2 = scmp.lt.u32.totalorder %s1039_s16, %s1034_s13 }
  0x19   : > { %p1037_p13 = pnand %p1036_p12, %p1035_p11  ;;  %p1043_p4 = scmp.lt.u32.totalorder %s1034_s13, %s1280_s8 }
  0x1a   : > { %p1042_p3 = por %p1041_p2, %p1040_p1 }
  0x1b   : > { %p1038_p0 = pneg %p1037_p13 }
  0x1c   : > { %p1044_p5 = por %p1043_p4, %p1042_p3 }
  0x1e   : > { %p1045_p6 = pnand %p1044_p5, %p1038_p0 }
  0x20   : > { %1048 = shalt.err (!%p1045_p6)
}
  0x21   : > { %s1049_s25 = scalar_lea.vmem %s1288_s10, 512  ;;  %s1180_s26 = smov [#allocation4]  }
  0x22   : > { %p1050_p8 = scmp.ne.s32.totalorder %s1288_s10, %s1049_s25  ;;  %s1054_s30 = sshll.u32 %s1180_s26, 4  ;;  %s1055_s30 = int_to_ptr.vmem [resolvable:$false] %s1054_s30 }
  0x23   : > { %s1056_s5 = scalar_lea.vmem %s1055_s30, 1024  ;;  %p1057_p10 = scmp.lt.s32.totalorder %s1288_s10, %s1055_s30 }
  0x24   : > { %p1052_p11 = pnand %p1050_p8, %p1036_p12  ;;  %p1058_p1 = scmp.lt.s32.totalorder %s1056_s5, %s1049_s25 }
  0x26   : > { %p1053_p13 = pneg %p1052_p11  ;;  %p1059_p2 = por %p1058_p1, %p1057_p10 }
  0x28   : > { %p1060_p3 = pnand %p1059_p2, %p1053_p13 }
  0x2a   : > { %1063 = shalt.err (!%p1060_p3)
}
  0x2b   : > { %s1181_s6 = smov 512   ;;  %s1182_s7 = smov 256  }
  0x2c   : > { %s1183_s9 = smov 16   ;;  %p243_p0 = scmp.lt.s32.totalorder %s1178_s22, 3 }
  0x2d   : > { %930 = dma.hbm_to_vmem [thread:$0]  (!%p1284_p9), %s1280_s8, 512, %s1288_s10, %s200_s12, %s1181_s6, %s1182_s7, %s1183_s9  }
  0x2e   : > { %s822_s13 = sshll.u32 %s1273_s29, 8  ;;  %s872_s14 = sshll.u32 %s1174_s21, 12 }
  0x2f   : > { %p1472_p10 = scmp.ge.s32.totalorder %s1178_s22, 1  ;;  %s1331_s24 = scalar_lea.hbm %s1465_s2, %s872_s14 }
  0x30   : > { %s227_s25 = scalar_lea.vmem [#allocation7], %s822_s13  ;;  %s224_s8 = scalar_lea.sflag [#allocation8], %s1273_s29 }
  0x31   : > { %p1324_p4 = pnand %p1472_p10, %p243_p0  ;;  %s235_s26 = sshll.u32 %s227_s25, 4  ;;  %s1333_s26 = int_to_ptr.vmem [resolvable:$true] %s235_s26 }
  0x32   : > { %s1064_s10 = scalar_lea.hbm %s1331_s24, 4096  ;;  %s1069_s5 = scalar_lea.hbm %s1465_s2, 8192 }
  0x33   : > { %p1065_p5 = scmp.ne.s32.totalorder %s1331_s24, %s1064_s10  ;;  %p1070_p11 = scmp.lt.u32.totalorder %s1331_s24, %s1465_s2 }
  0x34   : > { %p1071_p13 = scmp.lt.u32.totalorder %s1069_s5, %s1064_s10  ;;  %p1073_p2 = scmp.lt.u32.totalorder %s1064_s10, %s1331_s24 }
  0x35   : > { %p1067_p6 = pnand %p1065_p5, %p1036_p12 }
  0x36   : > { %p1072_p1 = por %p1071_p13, %p1070_p11 }
  0x37   : > { %p1068_p8 = pneg %p1067_p6 }
  0x38   : > { %p1074_p3 = por %p1073_p2, %p1072_p1 }
  0x3a   : > { %p1075_p0 = pnand %p1074_p3, %p1068_p8 }
  0x3c   : > { %1078 = shalt.err (!%p1075_p0)
}
  0x3d   : > { %s1079_s9 = scalar_lea.vmem %s1333_s26, 4096  ;;  %s1184_s13 = smov [#allocation7]  }
  0x3e   : > { %p1080_p10 = scmp.ne.s32.totalorder %s1333_s26, %s1079_s9  ;;  %s1084_s14 = sshll.u32 %s1184_s13, 4  ;;  %s1085_s14 = int_to_ptr.vmem [resolvable:$false] %s1084_s14 }
  0x3f   : > { %s1086_s16 = scalar_lea.vmem %s1085_s14, 8192  ;;  %p1087_p7 = scmp.lt.s32.totalorder %s1333_s26, %s1085_s14 }
  0x40   : > { %p1082_p5 = pnand %p1080_p10, %p1036_p12  ;;  %p1088_p11 = scmp.lt.s32.totalorder %s1086_s16, %s1079_s9 }
  0x42   : > { %p1083_p6 = pneg %p1082_p5  ;;  %p1089_p13 = por %p1088_p11, %p1087_p7 }
  0x44   : > { %p1090_p1 = pnand %p1089_p13, %p1083_p6 }
  0x46   : > { %1093 = shalt.err (!%p1090_p1)
}
  0x47   : > { %s1185_s17 = smov 64   ;;  %s1186_s25 = smov 4  }
  0x48   : > { %933 = dma.hbm_to_vmem [thread:$0]  (!%p1284_p9), %s1331_s24, 4096, %s1333_s26, %s224_s8, %s1185_s17, %s1185_s17, %s1186_s25  }
  0x49   : > { %247 = sbr.rel (%p1324_p4) target bundleno = 388 (0x184), region = 36  ;;  %s249_s10 = sand.u32 (!%p1324_p4), 1, %s1162_s18  }
  0x4a   : > { %s826_s12 = sshll.u32 (!%p1324_p4), %s249_s10, 5  ;;  %s250_s30 = scalar_lea.sflag (!%p1324_p4), [#allocation5], %s249_s10 }
  0x4b   : > { %s1364_s5 = scalar_lea.vmem (!%p1324_p4), [#allocation4], %s826_s12  ;;  %p1474_p7 = scmp.ne.s32.totalorder (!%p1324_p4), %s1470_s27, 0 }
  0x50   : > { %1145 = dma.done.wait (%p1474_p7), %s250_s30, 512  }
  0x51   : > { %1147 = vsyncadd (%p1474_p7), %s250_s30, 4294966784  ;;  %s827_s6 = sshll.u32 %s249_s10, 8  ;;  %s259_s11 = scalar_lea.sflag [#allocation8], %s249_s10 }
  0x52   : > { %s1370_s29 = scalar_lea.vmem [#allocation7], %s827_s6 }
  0x53   : > { %1149 = dma.done.wait (%p1474_p7), %s259_s11, 4096  }
  0x54   : > { %1151 = vsyncadd (%p1474_p7), %s259_s11, 4294963200  ;;  %p828_p9 = scmp.ne.s32.totalorder %s1170_s20, 0 }
  0x55   : > { %v1187_v0 = vmov (!%p828_p9), 0.0  }
  0x56   : > { %301 = sbr.rel (%p828_p9) target bundleno = 93 (0x5d), region = 48  ;;  %302 = vst [vmem:[#allocation2] sm:$0xff] (!%p828_p9), %v1187_v0  ;;  %303 = vst [vmem:[#allocation2 + $0x8] sm:$0xff] (!%p828_p9), %v1187_v0 }
  0x5d PF: > { %v994_v1 = vld [vmem:[%s1370_s29 + $0x40] sm:$0xff]   ;;  %v998_v5 = vld [vmem:[%s1370_s29 + $0x48] sm:$0xff]   ;;  %v1002_v9 = vld [vmem:[%s1370_s29 + $0x50] sm:$0xff]   ;;  %p865_p12 = scmp.ne.s32.totalorder %s1170_s20, 1 }
  0x5e   : > { %v995_v2 = vld [vmem:[%s1370_s29 + $0xc0] sm:$0xff]   ;;  %873 = vmatprep.subr.bf16.mxu0 %v994_v1  ;;  %v999_v6 = vld [vmem:[%s1370_s29 + $0xc8] sm:$0xff]   ;;  %v1003_v10 = vld [vmem:[%s1370_s29 + $0xd0] sm:$0xff]   ;;  %s676_s27 = sld [smem:[#allocation3]] (!%p865_p12) }
  0x5f   : > { %v996_v3 = vld [vmem:[%s1370_s29] sm:$0xff]   ;;  %895 = vmatprep.subr.bf16.mxu1 %v995_v2  ;;  %v1000_v7 = vld [vmem:[%s1370_s29 + $0x8] sm:$0xff]   ;;  %v1004_v11 = vld [vmem:[%s1370_s29 + $0x10] sm:$0xff]  }
  0x60   : > { %v997_v4 = vld [vmem:[%s1370_s29 + $0x80] sm:$0xff]   ;;  %874 = vmatpush3.bf16.msra.mxu0 %v996_v3  ;;  %v1001_v8 = vld [vmem:[%s1370_s29 + $0x88] sm:$0xff]   ;;  %v1005_v12 = vld [vmem:[%s1370_s29 + $0x90] sm:$0xff]  }
  0x61   : > { %896 = vmatpush3.bf16.msra.mxu1 %v997_v4  ;;  %875 = vmatprep.subr.bf16.mxu0 %v998_v5  ;;  %v1006_v13 = vld [vmem:[%s1370_s29 + $0x58] sm:$0xff]   ;;  %v1010_v17 = vld [vmem:[%s1370_s29 + $0x60] sm:$0xff]   ;;  %v1014_v21 = vld [vmem:[%s1370_s29 + $0x68] sm:$0xff]  }
  0x62   : > { %897 = vmatprep.subr.bf16.mxu1 %v999_v6  ;;  %v1007_v14 = vld [vmem:[%s1370_s29 + $0xd8] sm:$0xff]   ;;  %v1011_v18 = vld [vmem:[%s1370_s29 + $0xe0] sm:$0xff]   ;;  %v1015_v22 = vld [vmem:[%s1370_s29 + $0xe8] sm:$0xff]  }
  0x63   : > { %v1008_v15 = vld [vmem:[%s1370_s29 + $0x18] sm:$0xff]   ;;  %v1012_v19 = vld [vmem:[%s1370_s29 + $0x20] sm:$0xff]   ;;  %v1016_v23 = vld [vmem:[%s1370_s29 + $0x28] sm:$0xff]  }
  0x64   : > { %876 = vmatpush3.bf16.msra.mxu0 %v1000_v7  ;;  %v1009_v16 = vld [vmem:[%s1370_s29 + $0x98] sm:$0xff]   ;;  %v1013_v20 = vld [vmem:[%s1370_s29 + $0xa0] sm:$0xff]   ;;  %v1017_v24 = vld [vmem:[%s1370_s29 + $0xa8] sm:$0xff]   ;;  %v677_v55 = vstv (!%p865_p12), %s676_s27 }
  0x65   : > { %898 = vmatpush3.bf16.msra.mxu1 %v1001_v8  ;;  %877 = vmatprep.subr.bf16.mxu0 %v1002_v9  ;;  %v1018_v25 = vld [vmem:[%s1370_s29 + $0x70] sm:$0xff]   ;;  %v1022_v29 = vld [vmem:[%s1370_s29 + $0x78] sm:$0xff]   ;;  %1032 = vrcp.f32 (!%p865_p12), %v677_v55 }
  0x66   : > { %899 = vmatprep.subr.bf16.mxu1 %v1003_v10  ;;  %v1019_v26 = vld [vmem:[%s1370_s29 + $0xf0] sm:$0xff]   ;;  %v1023_v30 = vld [vmem:[%s1370_s29 + $0xf8] sm:$0xff]  }
  0x67   : > { %v1020_v27 = vld [vmem:[%s1370_s29 + $0x30] sm:$0xff]   ;;  %v1024_v31 = vld [vmem:[%s1370_s29 + $0x38] sm:$0xff]  }
  0x68   : > { %878 = vmatpush3.bf16.msra.mxu0 %v1004_v11  ;;  %v1021_v28 = vld [vmem:[%s1370_s29 + $0xb0] sm:$0xff]   ;;  %v1025_v32 = vld [vmem:[%s1370_s29 + $0xb8] sm:$0xff]  }
  0x69   : > { %900 = vmatpush3.bf16.msra.mxu1 %v1005_v12  ;;  %879 = vmatprep.subr.bf16.mxu0 %v1006_v13  ;;  %v1026_v33 = vld [vmem:[%s1364_s5] ss:$16 sps:$4 sm:$0xff]   ;;  %v1028_v34 = vld [vmem:[%s1364_s5 + $0x4] ss:$16 sps:$4 sm:$0xff]   ;;  %v1029_v35 = vld [vmem:[%s1364_s5 + $0x8] ss:$16 sps:$4 sm:$0xff]  }
  0x6a   : > { %901 = vmatprep.subr.bf16.mxu1 %v1007_v14  ;;  %v1031_v36 = vld [vmem:[%s1364_s5 + $0xc] ss:$16 sps:$4 sm:$0xff]   ;;  %618 = vmatprep.mubr.bf16.mxu0 %v1028_v34  ;;  %v304_v46 = vld [vmem:[#allocation2] sm:$0xff] }
  0x6b   : > { %659 = vmatprep.mubr.bf16.mxu1 %v1031_v36  ;;  %v305_v51 = vld [vmem:[#allocation2 + $0x8] sm:$0xff]  ;;  %v866_v59 = vld [vmem:[%s1466_s3] ss:$0 sm:$0xff] (!%p865_p12) }
  0x6c   : > { %880 = vmatpush3.bf16.msra.mxu0 %v1008_v15 }
  0x6d   : > { %902 = vmatpush3.bf16.msra.mxu1 %v1009_v16  ;;  %881 = vmatprep.subr.bf16.mxu0 %v1010_v17 }
  0x6e   : > { %903 = vmatprep.subr.bf16.mxu1 %v1011_v18 }
  0x6f   : > { %v1033_v56 = vpop.eup (!%p865_p12), %1032 }
  0x70   : > { %882 = vmatpush3.bf16.msra.mxu0 %v1012_v19  ;;  %917 = vpush (!%p865_p12), %v1033_v56 }
  0x71   : > { %904 = vmatpush3.bf16.msra.mxu1 %v1013_v20  ;;  %883 = vmatprep.subr.bf16.mxu0 %v1014_v21 }
  0x72   : > { %905 = vmatprep.subr.bf16.mxu1 %v1015_v22 }
  0x74   : > { %884 = vmatpush3.bf16.msra.mxu0 %v1016_v23 }
  0x75   : > { %906 = vmatpush3.bf16.msra.mxu1 %v1017_v24  ;;  %885 = vmatprep.subr.bf16.mxu0 %v1018_v25 }
  0x76   : > { %907 = vmatprep.subr.bf16.mxu1 %v1019_v26 }
  0x78   : > { %886 = vmatpush3.bf16.msra.mxu0 %v1020_v27 }
  0x79   : > { %908 = vmatpush3.bf16.msra.mxu1 %v1021_v28  ;;  %887 = vmatprep.subr.bf16.mxu0 %v1022_v29 }
  0x7a   : > { %909 = vmatprep.subr.bf16.mxu1 %v1023_v30 }
  0x7c   : > { %888 = vmatpush3.bf16.msra.mxu0 %v1024_v31 }
  0x7d   : > { %910 = vmatpush3.bf16.msra.mxu1 %v1025_v32 }
  0x7f   : > { %619 = vmatmul.mubr.bf16.vlgmr.msra.gmra.mrb[0].mxu0 %v1026_v33 }
  0x80   : > { %660 = vmatmul.mubr.bf16.vlgmr.msra.gmra.mrb[0].mxu1 %v1029_v35 }
  0xa1   : > { %s918_s26 = spop (!%p865_p12), %917 }
  0xa2   : > { %v691_v62 = vstv (!%p865_p12), %s918_s26 }
 0x152   : > { %v889_v37 = vpop.f32.mrb[0].mxu0 }
 0x153   : > { %v911_v38 = vpop.f32.mrb[0].mxu1  ;;  %v890_v39 = vpop.f32.mrb[1].mxu0 }
 0x154   : > { %v891_v40 = vadd.f32 %v890_v39, %v889_v37  ;;  %v912_v41 = vpop.f32.mrb[1].mxu1  ;;  %v892_v42 = vpop.f32.mrb[2].mxu0 }
 0x155   : > { %v913_v43 = vadd.f32 %v912_v41, %v911_v38  ;;  %v914_v44 = vpop.f32.mrb[2].mxu1  ;;  %v893_v45 = vpop.f32.mrb[3].mxu0 }
 0x156   : > { %v894_v47 = vadd.f32 %v893_v45, %v892_v42  ;;  %v915_v48 = vpop.f32.mrb[3].mxu1 }
 0x157   : > { %v662_v49 = vadd.f32 %v913_v43, %v891_v40  ;;  %v916_v50 = vadd.f32 %v915_v48, %v914_v44  ;;  %675 = sbr.rel (%p865_p12) target bundleno = 362 (0x16a), region = 52 }
 0x159   : > { %v668_v52 = vadd.f32 %v662_v49, %v304_v46  ;;  %v665_v53 = vadd.f32 %v916_v50, %v894_v47 }
 0x15b   : > { %670 = vst [vmem:[#allocation2] sm:$0xff] %v668_v52  ;;  %v669_v54 = vadd.f32 %v665_v53, %v305_v51 }
 0x15d   : > { %671 = vst [vmem:[#allocation2 + $0x8] sm:$0xff] %v669_v54 }
 0x162   : > { %v680_v57 = vld [vmem:[#allocation2] sm:$0xff] }
 0x163   : > { %v689_v60 = vadd.f32 %v866_v59, %v680_v57 }
 0x164   : > { %v681_v58 = vld [vmem:[#allocation2 + $0x8] sm:$0xff] }
 0x165   : > { %v690_v61 = vadd.f32 %v866_v59, %v681_v58  ;;  %v692_v63 = vmul.f32 %v691_v62, %v689_v60 }
 0x167   : > { %v693_v0 = vmul.f32 %v691_v62, %v690_v61  ;;  %694 = vst [vmem:[#allocation9] sm:$0xff] %v692_v63 }
 0x169   : > { %695 = vst [vmem:[#allocation9 + $0x8] sm:$0xff] %v693_v0 }
 0x16a PF: > { %p1419_p4 = scmp.eq.s32.totalorder %s815_s0, 1  ;;  %s1188_s8 = smov [#allocation9]  }
 0x16b   : > { %s706_s7 = sshll.u32 %s1188_s8, 4  ;;  %s707_s7 = int_to_ptr.vmem [resolvable:$true] %s706_s7 }
 0x16c   : > { %s1094_s9 = scalar_lea.vmem %s707_s7, 256  ;;  %p1101_p0 = scmp.lt.s32.totalorder %s707_s7, %s707_s7 }
 0x16d   : > { %p1095_p8 = scmp.ne.s32.totalorder %s707_s7, %s1094_s9  ;;  %p1102_p10 = scmp.lt.s32.totalorder %s1094_s9, %s1094_s9 }
 0x16f   : > { %p1096_p2 = pnand %p1095_p8, %p1419_p4  ;;  %p1103_p5 = por %p1102_p10, %p1101_p0 }
 0x171   : > { %p1097_p3 = pneg %p1096_p2 }
 0x173   : > { %p1104_p6 = pnand %p1103_p5, %p1097_p3 }
 0x175   : > { %1107 = shalt.err (!%p1104_p6)
}
 0x176   : > { %s1108_s0 = scalar_lea.hbm %s1467_s4, 256 }
 0x177   : > { %p1109_p11 = scmp.ne.s32.totalorder %s1467_s4, %s1108_s0  ;;  %p1114_p7 = scmp.lt.u32.totalorder %s1108_s0, %s1467_s4 }
 0x179   : > { %p1110_p13 = pnand %p1109_p11, %p1419_p4 }
 0x17b   : > { %p1111_p1 = pneg %p1110_p13 }
 0x17d   : > { %p1116_p9 = pnand %p1114_p7, %p1111_p1 }
 0x17f   : > { %1119 = shalt.err (!%p1116_p9)
}
 0x180   : > { %s1189_s12 = smov 128   ;;  %s1190_s30 = smov 8  }
 0x181   : > { %924 = dma.vmem_to_hbm [thread:$0]  (%p1419_p4), %s707_s7, 256, %s1467_s4, [#allocation6], %s1189_s12, %s1189_s12, %s1190_s30  }
 0x182   : > { %1153 = dma.done.wait (%p1419_p4), [#allocation6], 256  }
 0x183   : > { %1155 = vsyncadd (%p1419_p4), [#allocation6], 4294967040 }
 0x184 PF: > { %s22_s22 = sadd.s32 1, %s1178_s22   ;;  %s1476_s17 = smov %s1162_s18 }
 0x185   : > { %p19_p12 = scmp.ge.s32.totalorder %s22_s22, 4   ;;  %s1477_s18 = smov %s1166_s19 }
 0x186   : > { %s1478_s19 = smov %s1270_s28  ;;  %s1479_s20 = smov %s1174_s21 }
 0x187   : > { %s1480_s21 = smov %s1482_s23  ;;  %21 = sbr.rel (!%p19_p12) target bundleno = 9 (0x9), region = 98 }
 0x18e   :  { %722 = vsyncpa [#allocation5], 1 }
 0x18f   :  { %724 = vsyncpa [#allocation5 + $0x1], 1 }
 0x190   :  { %725 = vsyncpa [#allocation8], 1 }
 0x191   :  { %727 = vsyncpa [#allocation8 + $0x1], 1 }
 0x192   :  { %728 = vsyncpa [#allocation6], 1 }
 0x193   :  { %730 = vsyncpa [#allocation6 + $0x1], 1 }

</bundles_post_ra>
